<compile_context>
chip_gen: v7x
topology: tpu7x:2x2x1
jax: 0.10.0
libtpu: 0.0.40
codegen_flags: <defaults>
</compile_context>

<pallas_src>
import jax
import jax.numpy as jnp
import numpy as np
from jax.experimental import pallas as pl
from jax.experimental.pallas import tpu as pltpu


def _round_up(x, m):
    return ((x + m - 1) // m) * m


# --------------------------------------------------------------------------- kernel
def _conv1d_relu_kernel(x_ref, halo_ref, w_ref, b_ref, o_ref):
    """One (batch, H-tile, L-tile) grid step.

    x_ref:    (1, TL, C)     fp32  current sequence tile
    halo_ref: (1, nt, 2, C)  fp32  per-batch resident halo rows:
                                   [i, 0] = row just before tile i (zeros at l=0)
                                   [i, 1] = row just after  tile i (zeros at l=L-1)
    w_ref:    (3, C, TN)     bf16  per-tap weights (tap k = Conv1d kernel index k)
    b_ref:    (1, TN)        fp32
    o_ref:    (1, TL, TN)    fp32
    """
    i = pl.program_id(2)                         # sequence-tile index
    x_c = x_ref[0]                               # (TL, C) fp32
    halo = halo_ref[0, i]                        # (2, C)  fp32
    left = halo[0:1, :]                          # x[l0-1]  (or zeros)
    right = halo[1:2, :]                         # x[l0+TL] (or zeros)

    # Row-shifted views of the tile (x[l-1] and x[l+1]); halo rows fill the ends.
    x_prev = jnp.concatenate([left, x_c[:-1, :]], axis=0)   # (TL, C)
    x_next = jnp.concatenate([x_c[1:, :], right], axis=0)   # (TL, C)

    # Three per-tap MXU matmuls, fp32 accumulation (avoids lane-misaligned K=3C concat).
    acc = jnp.dot(x_c.astype(jnp.bfloat16), w_ref[1],
                  preferred_element_type=jnp.float32)
    acc = acc + jnp.dot(x_prev.astype(jnp.bfloat16), w_ref[0],
                        preferred_element_type=jnp.float32)
    acc = acc + jnp.dot(x_next.astype(jnp.bfloat16), w_ref[2],
                        preferred_element_type=jnp.float32)
    acc = acc + b_ref[...]
    o_ref[0] = jnp.maximum(acc, 0.0).astype(o_ref.dtype)


# --------------------------------------------------------------------------- tiling helpers
def _pick_seq_tile(L, target=512):
    """Multiple-of-8 sequence tile; prefers large tiles, keeps padding waste <= 12.5%."""
    L8 = _round_up(max(L, 1), 8)
    if L8 <= target:
        return L8
    for t in (512, 384, 256, 128, 64, 32, 16, 8):
        waste = _round_up(L8, t) - L8
        if waste * 8 <= L8:
            return t
    return 8


def _vmem_bytes(TL, C, TN, nt):
    # Double-buffered x / out / weight / bias tiles + per-batch resident halo.
    return (2 * TL * C * 4 + 2 * TL * TN * 4
            + 2 * 3 * C * TN * 2 + 2 * TN * 4
            + 2 * nt * 2 * C * 4)


def _vmem_limit_bytes():
    cap = 128 * 1024 * 1024
    try:
        info = pltpu.get_tpu_info()
        cap = int(getattr(info, "vmem_capacity_bytes", cap))
    except Exception:
        pass
    # At most half the physical VMEM, capped at 64 MiB (v5e/v6e -> 64 MiB, v7x -> 32 MiB).
    return max(32 * 1024 * 1024, min(64 * 1024 * 1024, cap // 2))


# --------------------------------------------------------------------------- wrapper
def reduce_dim_layer(x, weight, bias):
    """x: (B, L, C_in) fp32; weight: (H, C_in, 3) PyTorch Conv1d layout; bias: (H,).
    Returns (B, L, H) fp32 == ReLU(Conv1d(k=3, p=1))."""
    B, L, C = x.shape
    H = weight.shape[0]

    vmem_limit = _vmem_limit_bytes()
    budget = (vmem_limit * 3) // 4

    # ---- lane-dense output width + H tiling ---------------------------------
    H_pad = _round_up(H, 128)
    if 3 * C * H_pad * 2 <= 4 * 1024 * 1024:
        TN = H_pad                                   # weight tile stays fully resident
    else:                                            # stream H tiles (v7x VMEM budget)
        TN = 512 if H_pad % 512 == 0 else (256 if H_pad % 256 == 0 else 128)
    nh = H_pad // TN

    # ---- sequence tiling (ragged L -> zero-pad to a tile multiple) ----------
    TL = _pick_seq_tile(L)
    while TL > 64 and _vmem_bytes(TL, C, TN, _round_up(L, TL) // TL) > budget:
        TL = max(64, _round_up(TL // 2, 8))
    L_pad = _round_up(L, TL)
    nt = L_pad // TL
    x_p = x if L_pad == L else jnp.pad(x, ((0, 0), (0, L_pad - L), (0, 0)))

    # ---- tiny halo rows instead of a full padded copy of x -------------------
    xr = x_p.reshape(B, nt, TL, C)
    zrow = jnp.zeros((B, 1, C), x.dtype)
    left_rows = jnp.concatenate([zrow, xr[:, :-1, TL - 1, :]], axis=1)   # x[i*TL - 1]
    right_rows = jnp.concatenate([xr[:, 1:, 0, :], zrow], axis=1)        # x[(i+1)*TL]
    halo = jnp.stack([left_rows, right_rows], axis=2)                    # (B, nt, 2, C)

    # ---- parameters: per-tap (3, C, H_pad) bf16 weights, fp32 bias ----------
    w3 = jnp.transpose(weight, (2, 1, 0))                                # (3, C, H)
    if H_pad != H:
        w3 = jnp.pad(w3, ((0, 0), (0, 0), (0, H_pad - H)))
        bias_p = jnp.pad(bias, (0, H_pad - H))
    else:
        bias_p = bias
    w3 = w3.astype(jnp.bfloat16)
    b2d = bias_p.reshape(1, H_pad).astype(jnp.float32)

    out = pl.pallas_call(
        _conv1d_relu_kernel,
        out_shape=jax.ShapeDtypeStruct((B, L_pad, H_pad), jnp.float32),
        grid_spec=pltpu.PrefetchScalarGridSpec(
            num_scalar_prefetch=0,
            grid=(B, nh, nt),
            in_specs=[
                pl.BlockSpec((1, TL, C), lambda b, j, i: (b, i, 0)),
                pl.BlockSpec((1, nt, 2, C), lambda b, j, i: (b, 0, 0, 0)),  # resident / batch
                pl.BlockSpec((3, C, TN), lambda b, j, i: (0, 0, j)),        # resident / H tile
                pl.BlockSpec((1, TN), lambda b, j, i: (0, j)),
            ],
            out_specs=pl.BlockSpec((1, TL, TN), lambda b, j, i: (b, i, j)),
        ),
        compiler_params=pltpu.CompilerParams(
            dimension_semantics=("parallel", "parallel", "arbitrary"),
            vmem_limit_bytes=vmem_limit,
        ),
    )(x_p, halo, w3, b2d)

    return out[:, :L, :H]


# --------------------------------------------------------------------------- reference
def _reference(x, weight, bias):
    # Pure-JAX fp32 reference matching PyTorch Conv1d(k=3, p=1) + ReLU.
    B, L, C = x.shape
    x_pad = jnp.pad(x, ((0, 0), (1, 1), (0, 0)))
    y = bias[None, None, :]
    for k in range(3):
        # y[b,l,h] += sum_c x_pad[b, l+k, c] * weight[h, c, k]
        y = y + jnp.einsum("blc,hc->blh", x_pad[:, k:k + L, :], weight[:, :, k])
    return jnp.maximum(y, 0.0)


if __name__ == "__main__":
    # Small shapes consistent with the module's forward.
    B, L, input_dim, hidden_dim = 2, 8, 32, 16

    key = jax.random.PRNGKey(0)
    kx, kw, kb = jax.random.split(key, 3)

    x = jax.random.normal(kx, (B, L, input_dim), dtype=jnp.float32)

    # Deterministic param init mimicking PyTorch Conv1d default
    # (uniform in [-bound, bound], bound = 1/sqrt(C_in * kernel_size)).
    bound = 1.0 / np.sqrt(input_dim * 3)
    weight = jax.random.uniform(kw, (hidden_dim, input_dim, 3),
                                minval=-bound, maxval=bound, dtype=jnp.float32)
    bias = jax.random.uniform(kb, (hidden_dim,),
                              minval=-bound, maxval=bound, dtype=jnp.float32)

    out = jax.block_until_ready(reduce_dim_layer(x, weight, bias))
    ref = jax.block_until_ready(_reference(x, weight, bias))

    assert out.shape == (B, L, hidden_dim), out.shape
    # bf16 MXU operands with fp32 accumulation -> loosened tolerance vs fp32 ref.
    np.testing.assert_allclose(np.asarray(out), np.asarray(ref),
                               rtol=2e-2, atol=2e-2)

    print("KERNEL_OK")
</pallas_src>

<mosaic_0001>
module attributes {stable_mosaic.version = 11 : i64} {
  func.func @_conv1d_relu_kernel(%arg0: i32, %arg1: i32, %arg2: i32, %arg3: memref<1x8x32xf32, #tpu.memory_space<vmem>>, %arg4: memref<1x1x2x32xf32, #tpu.memory_space<vmem>>, %arg5: memref<3x32x128xbf16, #tpu.memory_space<vmem>>, %arg6: memref<1x128xf32, #tpu.memory_space<vmem>>, %arg7: memref<1x8x128xf32, #tpu.memory_space<vmem>>) attributes {dimension_semantics = [#tpu.dimension_semantics<parallel>, #tpu.dimension_semantics<parallel>, #tpu.dimension_semantics<arbitrary>], iteration_bounds = array<i64: 2, 1, 1>, scalar_prefetch = 0 : i64, scratch_operands = 0 : i64, tpu.core_type = #tpu.core_type<tc>, window_params = [{transform_indices = @transform_0, window_bounds = array<i64: 1, 8, 32>}, {transform_indices = @transform_1, window_bounds = array<i64: 1, 1, 2, 32>}, {transform_indices = @transform_2, window_bounds = array<i64: 3, 32, 128>}, {transform_indices = @transform_3, window_bounds = array<i64: 1, 128>}, {transform_indices = @transform_4, window_bounds = array<i64: 1, 8, 128>}]} {
    %c0 = arith.constant 0 : index
    %c0_0 = arith.constant 0 : index
    %c0_1 = arith.constant 0 : index
    %0 = vector.load %arg3[%c0, %c0_0, %c0_1] : memref<1x8x32xf32, #tpu.memory_space<vmem>>, vector<1x8x32xf32>
    %1 = vector.shape_cast %0 : vector<1x8x32xf32> to vector<8x32xf32>
    %c0_2 = arith.constant 0 : index
    %2 = arith.index_cast %arg2 : i32 to index
    %c0_3 = arith.constant 0 : index
    %c0_4 = arith.constant 0 : index
    %3 = vector.load %arg4[%c0_2, %2, %c0_3, %c0_4] : memref<1x1x2x32xf32, #tpu.memory_space<vmem>>, vector<1x1x2x32xf32>
    %4 = vector.shape_cast %3 : vector<1x1x2x32xf32> to vector<2x32xf32>
    %5 = vector.extract_strided_slice %4 {offsets = [0, 0], sizes = [1, 32], strides = [1, 1]} : vector<2x32xf32> to vector<1x32xf32>
    %6 = vector.extract_strided_slice %4 {offsets = [1, 0], sizes = [1, 32], strides = [1, 1]} : vector<2x32xf32> to vector<1x32xf32>
    %7 = vector.extract_strided_slice %1 {offsets = [0, 0], sizes = [7, 32], strides = [1, 1]} : vector<8x32xf32> to vector<7x32xf32>
    %8 = tpu.concatenate %5, %7 in 0 : vector<1x32xf32>, vector<7x32xf32> -> vector<8x32xf32>
    %9 = vector.extract_strided_slice %1 {offsets = [1, 0], sizes = [7, 32], strides = [1, 1]} : vector<8x32xf32> to vector<7x32xf32>
    %10 = tpu.concatenate %9, %6 in 0 : vector<7x32xf32>, vector<1x32xf32> -> vector<8x32xf32>
    %11 = arith.truncf %1 : vector<8x32xf32> to vector<8x32xbf16>
    %c1 = arith.constant 1 : index
    %c0_5 = arith.constant 0 : index
    %c0_6 = arith.constant 0 : index
    %12 = vector.load %arg5[%c1, %c0_5, %c0_6] : memref<3x32x128xbf16, #tpu.memory_space<vmem>>, vector<1x32x128xbf16>
    %13 = vector.shape_cast %12 : vector<1x32x128xbf16> to vector<32x128xbf16>
    %cst = arith.constant dense<0.000000e+00> : vector<8x128xf32>
    %14 = tpu.matmul %11, %13, %cst {dimension_numbers = #tpu.dot_dimension_numbers<[1], [0], [0], [1], [0, 0, 1, 1], [], []>} : vector<8x32xbf16>, vector<32x128xbf16>, vector<8x128xf32> -> vector<8x128xf32>
    %15 = arith.truncf %8 : vector<8x32xf32> to vector<8x32xbf16>
    %c0_7 = arith.constant 0 : index
    %c0_8 = arith.constant 0 : index
    %c0_9 = arith.constant 0 : index
    %16 = vector.load %arg5[%c0_7, %c0_8, %c0_9] : memref<3x32x128xbf16, #tpu.memory_space<vmem>>, vector<1x32x128xbf16>
    %17 = vector.shape_cast %16 : vector<1x32x128xbf16> to vector<32x128xbf16>
    %cst_10 = arith.constant dense<0.000000e+00> : vector<8x128xf32>
    %18 = tpu.matmul %15, %17, %cst_10 {dimension_numbers = #tpu.dot_dimension_numbers<[1], [0], [0], [1], [0, 0, 1, 1], [], []>} : vector<8x32xbf16>, vector<32x128xbf16>, vector<8x128xf32> -> vector<8x128xf32>
    %19 = arith.addf %14, %18 : vector<8x128xf32>
    %20 = arith.truncf %10 : vector<8x32xf32> to vector<8x32xbf16>
    %c2 = arith.constant 2 : index
    %c0_11 = arith.constant 0 : index
    %c0_12 = arith.constant 0 : index
    %21 = vector.load %arg5[%c2, %c0_11, %c0_12] : memref<3x32x128xbf16, #tpu.memory_space<vmem>>, vector<1x32x128xbf16>
    %22 = vector.shape_cast %21 : vector<1x32x128xbf16> to vector<32x128xbf16>
    %cst_13 = arith.constant dense<0.000000e+00> : vector<8x128xf32>
    %23 = tpu.matmul %20, %22, %cst_13 {dimension_numbers = #tpu.dot_dimension_numbers<[1], [0], [0], [1], [0, 0, 1, 1], [], []>} : vector<8x32xbf16>, vector<32x128xbf16>, vector<8x128xf32> -> vector<8x128xf32>
    %24 = arith.addf %19, %23 : vector<8x128xf32>
    %c0_14 = arith.constant 0 : index
    %c0_15 = arith.constant 0 : index
    %25 = vector.load %arg6[%c0_14, %c0_15] : memref<1x128xf32, #tpu.memory_space<vmem>>, vector<1x128xf32>
    %26 = vector.broadcast %25 : vector<1x128xf32> to vector<8x128xf32>
    %27 = arith.addf %24, %26 : vector<8x128xf32>
    %cst_16 = arith.constant 0.000000e+00 : f32
    %28 = vector.broadcast %cst_16 : f32 to vector<8x128xf32>
    %29 = arith.maximumf %27, %28 : vector<8x128xf32>
    %c0_17 = arith.constant 0 : index
    %c0_18 = arith.constant 0 : index
    %c0_19 = arith.constant 0 : index
    %30 = vector.load %arg7[%c0_17, %c0_18, %c0_19] : memref<1x8x128xf32, #tpu.memory_space<vmem>>, vector<1x8x128xf32>
    %31 = vector.shape_cast %30 : vector<1x8x128xf32> to vector<8x128xf32>
    %32 = vector.shape_cast %29 : vector<8x128xf32> to vector<1x8x128xf32>
    tpu.vector_store %arg7[%c0_17, %c0_18, %c0_19], %32 {strides = array<i32>} : memref<1x8x128xf32, #tpu.memory_space<vmem>>, vector<1x8x128xf32>,
    return
  }
  func.func @transform_0(%arg0: i32, %arg1: i32, %arg2: i32) -> (i32, i32, i32) {
    %c0_i32 = arith.constant 0 : i32
    %c0_i32_0 = arith.constant 0 : i32
    return %arg0, %arg2, %c0_i32 : i32, i32, i32
  }
  func.func @transform_1(%arg0: i32, %arg1: i32, %arg2: i32) -> (i32, i32, i32, i32) {
    %c0_i32 = arith.constant 0 : i32
    %c0_i32_0 = arith.constant 0 : i32
    %c0_i32_1 = arith.constant 0 : i32
    %c0_i32_2 = arith.constant 0 : i32
    return %arg0, %c0_i32, %c0_i32_0, %c0_i32_1 : i32, i32, i32, i32
  }
  func.func @transform_2(%arg0: i32, %arg1: i32, %arg2: i32) -> (i32, i32, i32) {
    %c0_i32 = arith.constant 0 : i32
    %c0_i32_0 = arith.constant 0 : i32
    %c0_i32_1 = arith.constant 0 : i32
    return %c0_i32, %c0_i32_0, %arg1 : i32, i32, i32
  }
  func.func @transform_3(%arg0: i32, %arg1: i32, %arg2: i32) -> (i32, i32) {
    %c0_i32 = arith.constant 0 : i32
    %c0_i32_0 = arith.constant 0 : i32
    return %c0_i32, %arg1 : i32, i32
  }
  func.func @transform_4(%arg0: i32, %arg1: i32, %arg2: i32) -> (i32, i32, i32) {
    %c0_i32 = arith.constant 0 : i32
    return %arg0, %arg2, %arg1 : i32, i32, i32
  }
}

</mosaic_0001>

<bundles_post_ra>
// kernel: tpu_custom_call.1
= control target key start
LH: loop header
LB: loop body
LE: loop exit
PB: predicated region body
PF: predicated region fallthrough
CT: control target
= control target key end

     0   :  { %s1380_s0 = inlined_call_operand.hbm [shape: f32[2,8,32], index: 0, kind: input, shape index: {}]   ;;  %s1381_s1 = inlined_call_operand.hbm [shape: f32[2,1,2,32], index: 1, kind: input, shape index: {}]   ;;  %s1382_s2 = inlined_call_operand.hbm [shape: bf16[3,32,128], index: 2, kind: input, shape index: {}]   ;;  %s1383_s3 = inlined_call_operand.hbm [shape: f32[1,128], index: 3, kind: input, shape index: {}]   ;;  %s1384_s4 = inlined_call_operand.hbm [shape: f32[2,8,128], index: 4, kind: output, shape index: {}]  }
   0x1   :  { %1389 = sst [smem:[#allocation16_spill]] %s1380_s0 }
   0x2   :  { %1390 = sst [smem:[#allocation17_spill]] %s1382_s2 }
   0x3   :  { %9 = vsyncpa [#allocation3], 0 }
   0x4   :  { %11 = vsyncpa [#allocation3 + $0x1], 0 }
   0x5   :  { %12 = vsyncpa [#allocation6], 0 }
   0x6   :  { %14 = vsyncpa [#allocation6 + $0x1], 0 }
   0x7   :  { %15 = vsyncpa [#allocation9], 0 }
   0x8   :  { %16 = vsyncpa [#allocation4], 0 }
   0x9   :  { %18 = vsyncpa [#allocation4 + $0x1], 0  ;;  %s1083_s15 = smov 0   ;;  %s1085_s16 = smov 0  }
   0xa   :  { %s1087_s17 = smov 0   ;;  %s1089_s18 = smov 0  }
   0xb   :  { %s1091_s19 = smov 0   ;;  %s1093_s20 = smov 0  }
   0xc LB: > { %s1114_s21 = sadd.s32 4294967295, %s1047_s20   ;;  %s677_s22 = sadd.s32 4294967294, %s1047_s20   ;;  %s1047_s20 = sphi %s1093_s20, %s24_s20   ;;  %s1043_s19 = sphi %s1091_s19, %s1414_s19   ;;  %s1039_s18 = sphi %s1089_s18, %s1413_s18   ;;  %s1035_s17 = sphi %s1087_s17, %s1412_s17   ;;  %s1031_s16 = sphi %s1085_s16, %s1411_s16   ;;  %s1027_s15 = sphi %s1083_s15, %s1410_s15  }
   0xd   : > { %p65_p0 = scmp.ne.s32.totalorder %s1031_s16, %s1027_s15  ;;  %p1385_p1 = scmp.eq.s32.totalorder %s1114_s21, 0 }
   0xe   : > { %p177_p3 = scmp.eq.s32.totalorder %s677_s22, 1  ;;  %p678_p5 = scmp.ge.s32.totalorder %s1047_s20, 1 }
   0xf   : > { %p1123_p4 = por %p1385_p1, %p65_p0  ;;  %p184_p7 = scmp.lt.s32.totalorder %s1047_s20, 3 }
  0x10   : > { %p1128_p6 = por %p177_p3, %p65_p0  ;;  %s1049_s26 = smov [#allocation7]  }
  0x11   : > { %s1391_s23 = scalar_select %p1123_p4, 1, 0 }
  0x12   : > { %s1392_s24 = scalar_select %p1128_p6, 1, 0 }
  0x13   : > { %p1133_p8 = pnand %p678_p5, %p184_p7  ;;  %s198_s27 = sshll.u32 %s1049_s26, 4  ;;  %s1137_s27 = int_to_ptr.vmem [resolvable:$true] %s198_s27 }
  0x14   : > { %s1050_s29 = smov [#allocation8]   ;;  %s1395_s2 = sld [smem:[#allocation17_spill]] }
  0x15   : > { %s1393_s25 = scalar_select %p1133_p8, 1, 0 }
  0x16   : > { %p753_p9 = pneg %p1133_p8  ;;  %s214_s30 = sshll.u32 %s1050_s29, 4  ;;  %s1148_s30 = int_to_ptr.vmem [resolvable:$true] %s214_s30 }
  0x18   : > { %p1144_p11 = pnand %p753_p9, %p1385_p1 }
  0x1a   : > { %s837_s7 = scalar_lea.hbm %s1395_s2, 768  ;;  %p839_p13 = pneg %p1144_p11 }
  0x1b   : > { %p838_p12 = scmp.ne.s32.totalorder %s1395_s2, %s837_s7  ;;  %p844_p5 = scmp.lt.u32.totalorder %s837_s7, %s1395_s2 }
  0x1d   : > { %p840_p0 = pnand %p839_p13, %p838_p12 }
  0x1f   : > { %p841_p3 = pneg %p840_p0 }
  0x21   : > { %p846_p7 = pnand %p844_p5, %p841_p3 }
  0x23   : > { %849 = shalt.err (!%p846_p7)
}
  0x24   : > { %s850_s12 = scalar_lea.vmem %s1137_s27, 768  ;;  %p858_p2 = scmp.lt.s32.totalorder %s1137_s27, %s1137_s27 }
  0x25   : > { %p851_p9 = scmp.ne.s32.totalorder %s1137_s27, %s850_s12  ;;  %p859_p12 = scmp.lt.s32.totalorder %s850_s12, %s850_s12 }
  0x27   : > { %p853_p10 = pnand %p851_p9, %p839_p13  ;;  %p860_p0 = por %p859_p12, %p858_p2 }
  0x29   : > { %p854_p1 = pneg %p853_p10 }
  0x2b   : > { %p861_p6 = pnand %p860_p0, %p854_p1 }
  0x2d   : > { %864 = shalt.err (!%p861_p6)
}
  0x2e   : > { %s1051_s13 = smov 64   ;;  %s1052_s14 = smov 4  }
  0x2f   : > { %756 = dma.hbm_to_vmem [thread:$0]  (!%p1144_p11), %s1395_s2, 768, %s1137_s27, [#allocation6], %s1051_s13, %s1051_s13, %s1052_s14  }
  0x30   : > { %s865_s6 = scalar_lea.hbm %s1383_s3, 16 }
  0x31   : > { %p866_p2 = scmp.ne.s32.totalorder %s1383_s3, %s865_s6  ;;  %p872_p10 = scmp.lt.u32.totalorder %s865_s6, %s1383_s3 }
  0x33   : > { %p868_p1 = pnand %p866_p2, %p839_p13 }
  0x35   : > { %p869_p6 = pneg %p868_p1 }
  0x37   : > { %p874_p3 = pnand %p872_p10, %p869_p6 }
  0x39   : > { %877 = shalt.err (!%p874_p3)
}
  0x3a   : > { %s878_s27 = scalar_lea.vmem %s1148_s30, 16  ;;  %s885_s11 = scalar_lea.vmem %s1148_s30, 32 }
  0x3b   : > { %p879_p5 = scmp.ne.s32.totalorder %s1148_s30, %s878_s27  ;;  %p886_p12 = scmp.lt.s32.totalorder %s1148_s30, %s1148_s30 }
  0x3c   : > { %p887_p0 = scmp.lt.s32.totalorder %s885_s11, %s878_s27 }
  0x3d   : > { %p881_p7 = pnand %p879_p5, %p839_p13 }
  0x3e   : > { %p888_p2 = por %p887_p0, %p886_p12 }
  0x3f   : > { %p882_p9 = pneg %p881_p7 }
  0x41   : > { %p889_p1 = pnand %p888_p2, %p882_p9 }
  0x43   : > { %892 = shalt.err (!%p889_p1)
}
  0x44   : > { %759 = dma.hbm_to_vmem [thread:$0]  (!%p1144_p11), %s1383_s3, 16, %s1148_s30, [#allocation9]  }
  0x45   : > { %s43_s14 = sadd.s32 1, %s1043_s19  ;;  %s52_s22 = sadd.s32 1, %s1035_s17 }
  0x46   : > { %p45_p13 = scmp.ge.s32.totalorder %s43_s14, 2  ;;  %p59_p6 = scmp.ne.s32.totalorder %s1035_s17, %s1031_s16 }
  0x47   : > { %p60_p10 = scmp.eq.s32.totalorder %s1047_s20, 0  ;;  %p773_p3 = scmp.lt.s32.totalorder %s1047_s20, 2 }
  0x48   : > { %s1416_s14 = smov (%p45_p13, %s43_s14), 0  ;;  %p1396_p7 = scmp.eq.s32.totalorder %s1114_s21, 1 }
  0x49   : > { %p61_p5 = por %p60_p10, %p59_p6  ;;  %s47_s26 = ssub.s32 %s1043_s19, %s1416_s14 }
  0x4a   : > { %p1213_p9 = por %p1396_p7, %p59_p6  ;;  %s1220_s29 = sand.u32 1, %s1035_s17  }
  0x4b   : > { %p50_p11 = scmp.eq.s32.totalorder %s47_s26, 0  ;;  %s682_s30 = sshll.u32 %s1220_s29, 3 }
  0x4c   : > { %s1397_s28 = scalar_select %p1213_p9, 1, 0 }
  0x4d   : > { %s683_s5 = sshll.u32 %s1043_s19, 7  ;;  %s1398_s0 = sld [smem:[#allocation16_spill]] }
  0x4e   : > { %s1225_s6 = scalar_select %p50_p11, %s1035_s17, %s52_s22  }
  0x4f   : > { %s229_s10 = scalar_lea.vmem [#allocation2], %s682_s30  ;;  %p1234_p12 = pnand %p773_p3, %p61_p5 }
  0x50   : > { %s237_s27 = sshll.u32 %s229_s10, 4  ;;  %s226_s13 = scalar_lea.sflag [#allocation3], %s1220_s29  ;;  %s1238_s27 = int_to_ptr.vmem [resolvable:$true] %s237_s27 }
  0x51   : > { %p895_p2 = pneg %p1234_p12 }
  0x53   : > { %s1230_s9 = scalar_lea.hbm %s1398_s0, %s683_s5  ;;  %s898_s5 = scalar_lea.hbm %s1398_s0, 256 }
  0x54   : > { %s893_s22 = scalar_lea.hbm %s1230_s9, 128  ;;  %p899_p6 = scmp.lt.u32.totalorder %s1230_s9, %s1398_s0 }
  0x55   : > { %p894_p0 = scmp.ne.s32.totalorder %s1230_s9, %s893_s22  ;;  %p900_p10 = scmp.lt.u32.totalorder %s898_s5, %s893_s22 }
  0x56   : > { %p902_p5 = scmp.lt.u32.totalorder %s893_s22, %s1230_s9 }
  0x57   : > { %p896_p1 = pnand %p895_p2, %p894_p0  ;;  %p901_p3 = por %p900_p10, %p899_p6 }
  0x59   : > { %p897_p13 = pneg %p896_p1  ;;  %p903_p7 = por %p902_p5, %p901_p3 }
  0x5b   : > { %p904_p11 = pnand %p903_p7, %p897_p13 }
  0x5d   : > { %907 = shalt.err (!%p904_p11)
}
  0x5e   : > { %s908_s10 = scalar_lea.vmem %s1238_s27, 128  ;;  %s1053_s26 = smov [#allocation2]  }
  0x5f   : > { %p909_p0 = scmp.ne.s32.totalorder %s1238_s27, %s908_s10  ;;  %s913_s30 = sshll.u32 %s1053_s26, 4  ;;  %s914_s30 = int_to_ptr.vmem [resolvable:$false] %s913_s30 }
  0x60   : > { %s915_s7 = scalar_lea.vmem %s914_s30, 256  ;;  %p916_p4 = scmp.lt.s32.totalorder %s1238_s27, %s914_s30 }
  0x61   : > { %p911_p1 = pnand %p909_p0, %p895_p2  ;;  %p917_p6 = scmp.lt.s32.totalorder %s915_s7, %s908_s10 }
  0x63   : > { %p912_p9 = pneg %p911_p1  ;;  %p918_p10 = por %p917_p6, %p916_p4 }
  0x65   : > { %p919_p3 = pnand %p918_p10, %p912_p9 }
  0x67   : > { %922 = shalt.err (!%p919_p3)
}
  0x68   : > { %763 = dma.hbm_to_vmem [thread:$0]  (!%p1234_p12), %s1230_s9, 128, %s1238_s27, %s226_s13  }
  0x69   : > { %s684_s22 = sshll.u32 %s1220_s29, 1  ;;  %s685_s5 = sshll.u32 %s1043_s19, 5 }
  0x6a   : > { %s1272_s12 = scalar_lea.hbm %s1381_s1, %s685_s5  ;;  %s248_s10 = scalar_lea.vmem [#allocation5], %s684_s22 }
  0x6b   : > { %s255_s30 = sshll.u32 %s248_s10, 4  ;;  %s1400_s7 = sand.u32 1, %s1047_s20   ;;  %s256_s30 = int_to_ptr.vmem [resolvable:$true] %s255_s30 }
  0x6c   : > { %s245_s0 = scalar_lea.sflag [#allocation6], %s1400_s7  ;;  %s923_s2 = scalar_lea.hbm %s1272_s12, 32 }
  0x6d   : > { %p924_p4 = scmp.ne.s32.totalorder %s1272_s12, %s923_s2  ;;  %s928_s27 = scalar_lea.hbm %s1381_s1, 64 }
  0x6e   : > { %p929_p5 = scmp.lt.u32.totalorder %s1272_s12, %s1381_s1  ;;  %p930_p7 = scmp.lt.u32.totalorder %s928_s27, %s923_s2 }
  0x6f   : > { %p926_p9 = pnand %p924_p4, %p895_p2  ;;  %p932_p0 = scmp.lt.u32.totalorder %s923_s2, %s1272_s12 }
  0x70   : > { %p931_p11 = por %p930_p7, %p929_p5 }
  0x71   : > { %p927_p13 = pneg %p926_p9 }
  0x72   : > { %p933_p1 = por %p932_p0, %p931_p11 }
  0x74   : > { %p934_p6 = pnand %p933_p1, %p927_p13 }
  0x76   : > { %937 = shalt.err (!%p934_p6)
}
  0x77   : > { %s938_s22 = scalar_lea.vmem %s256_s30, 32  ;;  %s1054_s8 = smov [#allocation5]  }
  0x78   : > { %p939_p10 = scmp.ne.s32.totalorder %s256_s30, %s938_s22  ;;  %s943_s26 = sshll.u32 %s1054_s8, 4  ;;  %s944_s26 = int_to_ptr.vmem [resolvable:$false] %s943_s26 }
  0x79   : > { %s945_s10 = scalar_lea.vmem %s944_s26, 64  ;;  %p946_p9 = scmp.lt.s32.totalorder %s256_s30, %s944_s26 }
  0x7a   : > { %p941_p3 = pnand %p939_p10, %p895_p2  ;;  %p947_p8 = scmp.lt.s32.totalorder %s945_s10, %s938_s22 }
  0x7c   : > { %p942_p4 = pneg %p941_p3  ;;  %p948_p5 = por %p947_p8, %p946_p9 }
  0x7e   : > { %p949_p7 = pnand %p948_p5, %p942_p4 }
  0x80   : > { %952 = shalt.err (!%p949_p7)
}
  0x81   : > { %766 = dma.hbm_to_vmem [thread:$0]  (!%p1234_p12), %s1272_s12, 32, %s256_s30, %s245_s0  }
  0x82   : > { %p1401_p13 = scmp.ne.s32.totalorder %s1393_s25, 0 }
  0x83   : > { %s1298_s2 = sand.u32 (!%p1401_p13), 1, %s1031_s16   ;;  %p1402_p8 = scmp.ne.s32.totalorder (!%p1401_p13), %s1391_s23, 0 }
  0x84   : > { %264 = sbr.rel (%p1401_p13) target bundleno = 400 (0x190), region = 36  ;;  %s687_s7 = sshll.u32 (!%p1401_p13), %s1298_s2, 3 }
  0x85   : > { %s267_s29 = scalar_lea.sflag (!%p1401_p13), [#allocation3], %s1298_s2  ;;  %s270_s9 = scalar_lea.vmem (!%p1401_p13), [#allocation2], %s687_s7 }
  0x8b   : > { %1006 = dma.done.wait (%p1402_p8), %s267_s29, 128  }
  0x8c   : > { %1008 = vsyncadd (%p1402_p8), %s267_s29, 4294967168  ;;  %s275_s0 = sand.u32 1, %s1114_s21   ;;  %s688_s25 = sshll.u32 %s1298_s2, 1 }
  0x8d   : > { %s276_s11 = scalar_lea.sflag [#allocation6], %s275_s0  ;;  %s279_s12 = scalar_lea.vmem [#allocation5], %s688_s25 }
  0x8e   : > { %1010 = dma.done.wait (%p1402_p8), %s276_s11, 32  }
  0x8f   : > { %1012 = vsyncadd (%p1402_p8), %s276_s11, 4294967264  ;;  %p1403_p12 = scmp.eq.s32.totalorder %s1114_s21, 0 }
  0x91   : > { %1014 = dma.done.wait (%p1403_p12), [#allocation6], 768   ;;  %p1404_p2 = pmov %p1403_p12 }
  0x93   : > { %1016 = vsyncadd (%p1404_p2), [#allocation6], 4294966528  ;;  %p1405_p11 = pmov %p1404_p2 }
  0x94   : > { %p1406_p0 = pmov %p1404_p2 }
  0x95   : > { %1018 = dma.done.wait (%p1405_p11), [#allocation9], 16  }
  0x96   : > { %1020 = vsyncadd (%p1406_p0), [#allocation9], 4294967280  ;;  %v1055_v0 = vmov 0.0   ;;  %vm1056_vm0 = vmmov 0   ;;  %v831_v1 = vld [vmem:[#allocation7] sm:$0xff]   ;;  %v832_v2 = vld [vmem:[#allocation7 + $0x10] sm:$0xff]  }
  0x97   : > { %715 = vmatprep.subr.bf16.mxu0 %v1055_v0  ;;  %723 = vmatprep.subr.bf16.mxu1 %v1055_v0  ;;  %v833_v3 = vld [vmem:[#allocation7 + $0x8] sm:$0xff]   ;;  %v834_v4 = vld [vmem:[#allocation7 + $0x18] sm:$0xff]   ;;  %vm325_vm1 = vcmask 1040384   ;;  %vm357_vm2 = vcmask 261120   ;;  %v835_v11 = vld [vmem:[#allocation7 + $0x20] sm:$0xff]   ;;  %vm332_vm3 = vcmask 1046528  }
  0x98   : > { %719 = vmatprep.mubr.msk.bf16.mxu0 %vm1056_vm0, %v1055_v0  ;;  %727 = vmatprep.mubr.msk.bf16.mxu1 %vm1056_vm0, %v1055_v0  ;;  %v318_v5 = vld [vmem:[%s270_s9] sm:$0xff]  ;;  %v321_v6 = vld [vmem:[%s279_s12] sm:$0x3]  ;;  %s703_s21 = sshll.u32 %s1039_s18, 7  ;;  %s316_s23 = scalar_lea.vmem [#allocation10], %s687_s7 }
  0x99   : > { %716 = vmatpush3.bf16.msra.mxu0 %v831_v1  ;;  %724 = vmatpush3.bf16.msra.mxu1 %v832_v2  ;;  %v323_v7 = vrot.slane %v318_v5, 7  ;;  %v334_v8 = vpack.c.bf16 %v318_v5, %v318_v5  ;;  %v330_v10 = vrot.slane %v321_v6, 2  ;;  %v327_v12 = vrot.slane %v318_v5, 1  ;;  %v836_v14 = vld [vmem:[#allocation7 + $0x28] sm:$0xff]   ;;  %v701_v27 = vld [vmem:[#allocation8] ss:$0 sm:$0xff]  ;;  %s1331_s5 = scalar_lea.hbm %s1384_s4, %s703_s21 }
  0x9a   : > { %717 = vmatprep.subr.bf16.mxu0 %v1055_v0  ;;  %725 = vmatprep.subr.bf16.mxu1 %v1055_v0  ;;  %s544_s30 = sshll.u32 %s316_s23, 4  ;;  %s529_s22 = scalar_lea.sflag [#allocation4], %s1298_s2  ;;  %s1333_s30 = int_to_ptr.vmem [resolvable:$true] %s544_s30 }
  0x9b   : > { %v326_v9 = vsel %vm325_vm1, %v321_v6, %v323_v7  ;;  %v333_v15 = vsel %vm332_vm3, %v327_v12, %v330_v10  ;;  %s953_s8 = scalar_lea.vmem %s1333_s30, 128  ;;  %p1407_p6 = scmp.ne.s32.totalorder %s1397_s28, 0 }
  0x9c   : > { %v340_v13 = vpack.c.bf16 %v326_v9, %v326_v9  ;;  %v456_v16 = vpack.c.bf16 %v333_v15, %v333_v15  ;;  %p954_p1 = scmp.ne.s32.totalorder %s1333_s30, %s953_s8  ;;  %s1057_s18 = smov [#allocation10]  }
  0x9d   : > { %718 = vmatpush3.bf16.msra.mxu0 %v833_v3  ;;  %726 = vmatpush3.bf16.msra.mxu1 %v834_v4  ;;  %s957_s26 = sshll.u32 %s1057_s18, 4  ;;  %s958_s26 = int_to_ptr.vmem [resolvable:$false] %s957_s26 }
  0x9e   : > { %731 = vmatprep.subr.bf16.mxu0 %v1055_v0  ;;  %p955_p10 = pnand %p954_p1, %p1407_p6  ;;  %s959_s10 = scalar_lea.vmem %s958_s26, 256 }
  0x9f   : > { %p960_p4 = scmp.lt.s32.totalorder %s1333_s30, %s958_s26  ;;  %p961_p9 = scmp.lt.s32.totalorder %s959_s10, %s953_s8 }
  0xa0   : > { %720 = vmatmul.mubr.msk.bf16.vlgmr.msra.gmra.mrb[0].mxu0 %vm357_vm2, %v340_v13  ;;  %728 = vmatmul.mubr.msk.bf16.vlgmr.msra.gmra.mrb[0].mxu1 %vm357_vm2, %v334_v8  ;;  %p956_p3 = pneg %p955_p10 }
  0xa1   : > { %732 = vmatpush3.bf16.msra.mxu0 %v835_v11  ;;  %735 = vmatprep.mubr.msk.bf16.mxu0 %vm1056_vm0, %v1055_v0  ;;  %p962_p5 = por %p961_p9, %p960_p4 }
  0xa2   : > { %733 = vmatprep.subr.bf16.mxu0 %v1055_v0 }
  0xa3   : > { %p963_p7 = pnand %p962_p5, %p956_p3 }
  0xa5   : > { %734 = vmatpush3.bf16.msra.mxu0 %v836_v14 }
  0xa8   : > { %736 = vmatmul.mubr.msk.bf16.vlgmr.msra.gmra.mrb[4].mxu0 %vm357_vm2, %v456_v16 }
 0x173   : > { %v395_v17 = vpop.f32.mrb[0].mxu0  ;;  %v450_v18 = vpop.f32.mrb[0].mxu1 }
 0x174   : > { %v721_v19 = vpop.f32.mrb[1].mxu0  ;;  %v451_v20 = vadd.f32 %v450_v18, %v395_v17  ;;  %v729_v21 = vpop.f32.mrb[1].mxu1 }
 0x175   : > { %v398_v22 = vpop.f32.mrb[2].mxu0  ;;  %v453_v23 = vpop.f32.mrb[2].mxu1 }
 0x176   : > { %v722_v24 = vpop.f32.mrb[3].mxu0  ;;  %v730_v25 = vpop.f32.mrb[3].mxu1 }
 0x17b   : > { %v511_v26 = vpop.f32.mrb[4].mxu0 }
 0x17c   : > { %v517_v28 = vadd.f32 %v511_v26, %v451_v20  ;;  %v737_v29 = vpop.f32.mrb[5].mxu0 }
 0x17d   : > { %v514_v30 = vpop.f32.mrb[6].mxu0 }
 0x17e   : > { %v525_v31 = vadd.f32 %v701_v27, %v517_v28  ;;  %v738_v32 = vpop.f32.mrb[7].mxu0 }
 0x180   : > { %v526_v33 = vmax.f32 %v525_v31, 0.0 }
 0x182   : > { %527 = vst [vmem:[%s316_s23] sm:$0xff] %v526_v33 }
 0x183   : > { %966 = shalt.err (!%p963_p7)
}
 0x184   : > { %s967_s2 = scalar_lea.hbm %s1331_s5, 128  ;;  %s971_s9 = scalar_lea.hbm %s1384_s4, 256 }
 0x185   : > { %p968_p13 = scmp.ne.s32.totalorder %s1331_s5, %s967_s2  ;;  %p972_p2 = scmp.lt.u32.totalorder %s1331_s5, %s1384_s4 }
 0x186   : > { %p973_p11 = scmp.lt.u32.totalorder %s971_s9, %s967_s2  ;;  %p975_p1 = scmp.lt.u32.totalorder %s967_s2, %s1331_s5 }
 0x187   : > { %p969_p8 = pnand %p968_p13, %p1407_p6 }
 0x188   : > { %p974_p0 = por %p973_p11, %p972_p2 }
 0x189   : > { %p970_p12 = pneg %p969_p8 }
 0x18a   : > { %p976_p10 = por %p975_p1, %p974_p0 }
 0x18c   : > { %p977_p3 = pnand %p976_p10, %p970_p12 }
 0x18e   : > { %980 = shalt.err (!%p977_p3)
}
 0x18f   : > { %751 = dma.vmem_to_hbm [thread:$0]  (%p1407_p6), %s1333_s30, 128, %s1331_s5, %s529_s22  }
 0x190 PF: > { %s556_s11 = sand.u32 1, %s1027_s15   ;;  %p1408_p4 = scmp.ne.s32.totalorder %s1392_s24, 0 }
 0x191   : > { %p1409_p9 = scmp.ge.s32.totalorder %s1047_s20, 2  ;;  %s557_s12 = scalar_lea.sflag [#allocation4], %s556_s11 }
 0x193   : > { %p768_p5 = pnand %p1409_p9, %p1408_p4 }
 0x195   : > { %1022 = dma.done.wait (!%p768_p5), %s557_s12, 128  }
 0x196   : > { %1024 = vsyncadd (!%p768_p5), %s557_s12, 4294967168  ;;  %s24_s20 = sadd.s32 1, %s1047_s20   ;;  %s1410_s15 = smov %s1031_s16 }
 0x197   : > { %p21_p7 = scmp.ge.s32.totalorder %s24_s20, 4   ;;  %s1411_s16 = smov %s1035_s17 }
 0x198   : > { %s1412_s17 = smov %s1225_s6  ;;  %s1413_s18 = smov %s1043_s19 }
 0x199   : > { %s1414_s19 = smov %s1416_s14  ;;  %23 = sbr.rel (!%p21_p7) target bundleno = 12 (0xc), region = 107 }
 0x1a0   :  { %562 = vsyncpa [#allocation3], 1 }
 0x1a1   :  { %564 = vsyncpa [#allocation3 + $0x1], 1 }
 0x1a2   :  { %565 = vsyncpa [#allocation6], 1 }
 0x1a3   :  { %567 = vsyncpa [#allocation6 + $0x1], 1 }
 0x1a4   :  { %568 = vsyncpa [#allocation9], 1 }
 0x1a5   :  { %569 = vsyncpa [#allocation4], 1 }
 0x1a6   :  { %571 = vsyncpa [#allocation4 + $0x1], 1 }

</bundles_post_ra>
